<compile_context>
chip_gen: v7x
topology: tpu7x:2x2x1
jax: 0.10.0
libtpu: 0.0.40
codegen_flags: <defaults>
</compile_context>

<pallas_src>
import functools

import jax
import jax.numpy as jnp
from jax.experimental import pallas as pl
from jax.experimental.pallas import tpu as pltpu

_MIB = 1024 * 1024


def _vmem_budgets():
    """Per-generation VMEM sizing (v5e/v6e: 128 MiB physical, v7x: 64 MiB/TC)."""
    try:
        cap = int(pltpu.get_tpu_info().vmem_capacity_bytes)
    except Exception:
        cap = 64 * _MIB                       # conservative fallback (v7x per-TC)
    limit = min(int(cap * 0.75), 112 * _MIB)  # headroom for compiler scratch
    budget = int(limit * 0.6)                 # planning budget for block sizing
    return limit, budget


def _choose_group_size(B, H, Lq, Lk, D, qkv_itemsize, *, mask_per_head,
                       has_dropout, p_itemsize, budget_bytes):
    """Largest head-group size G (divisor of H) whose double-buffered blocks fit
    the VMEM budget, preferring >= 4 grid steps (v7x: 2 TCs, balanced)."""
    divisors = [g for g in range(1, H + 1) if H % g == 0]
    best = 1
    for g in divisors:
        mask_elems = (g if mask_per_head else 1) * Lq * Lk
        per_step = 2 * (                       # x2: double-buffered pipeline
            g * Lq * D * qkv_itemsize          # q block
            + 2 * g * Lk * D * qkv_itemsize    # k + v blocks
            + mask_elems * 4                   # mask block (f32 upper bound)
            + g * Lq * D * 4                   # out block (f32 upper bound)
            + g * Lq * Lk * p_itemsize         # p_attn block (0 when not returned)
            + (g * Lq * Lk * 2 if has_dropout else 0)   # bf16 keep-mask block
        )
        per_step += 2 * g * Lq * Lk * 4        # in-flight f32 scores / exp
        if per_step <= budget_bytes:
            best = g
    while best > 1 and B * (H // best) < 4:    # keep both v7x TCs busy & balanced
        best = max(d for d in divisors if d < best)
    return best


def _attn_kernel(*refs, temperature, keep_prob, return_p, approx_recip):
    # refs = (q, k, v, mask[, keep_mask], out[, p_attn])
    has_dropout = keep_prob < 1.0
    q_ref, k_ref, v_ref, mask_ref = refs[:4]
    i = 4
    keep_ref = None
    if has_dropout:
        keep_ref = refs[i]
        i += 1
    out_ref = refs[i]
    i += 1
    p_ref = refs[i] if return_p else None

    # Block shapes: q (1,G,Lq,D), k/v (1,G,Lk,D), mask (1, G or 1, Lq, Lk),
    #               keep (1,G,Lq,Lk), out (1,G,Lq,D), p_attn (1,G,Lq,Lk)
    # Scale q (G*Lq*D elems) instead of the scores (G*Lq*Lk elems).
    q = q_ref[0] * (1.0 / temperature)         # stays in q's dtype (f32 or bf16)
    k = k_ref[0]
    v = v_ref[0]
    m = mask_ref[0].astype(jnp.float32)        # (G or 1, Lq, Lk)

    # scores = (q/T) @ k^T + mask  — batched over the head group, contraction on
    # the last dims (dot_general with batch dim) -> MXU-friendly, no transpose.
    s = jnp.einsum("gqd,gkd->gqk", q, k, preferred_element_type=jnp.float32)
    s = s + m                                  # m broadcasts over G if needed

    # numerically-stable softmax along the key axis (f32 throughout)
    s_max = jnp.max(s, axis=-1, keepdims=True)
    e = jnp.exp(s - s_max)
    denom = jnp.sum(e, axis=-1, keepdims=True)
    inv = pl.reciprocal(denom, approx=approx_recip)   # (G, Lq, 1)

    if has_dropout:
        # Inverted dropout, with the 1/keep_prob scale fused into the softmax
        # normalizer (one fewer full-size VPU multiply).
        keep = keep_ref[0].astype(jnp.float32)        # (G, Lq, Lk) of {0,1}
        p = e * (inv * (1.0 / keep_prob)) * keep
    else:
        p = e * inv

    if return_p:
        p_ref[0] = p.astype(p_ref.dtype)
    out_ref[0] = jnp.einsum("gqk,gkd->gqd", p.astype(v.dtype), v,
                            preferred_element_type=jnp.float32
                            ).astype(out_ref.dtype)


def self_attention(query, key, value, mask, *, temperature, dropout_rate=0.0,
                   dropout_seed=0, mxu_dtype=None, group_size=None,
                   return_p_attn=True, p_dtype=jnp.float32, approx_recip=None):
    """query/key/value: [B,H,L,D]; mask: additive, broadcastable to [B,H,Lq,Lk].

    Returns (out, p_attn) like the PyTorch module; p_attn is None when
    return_p_attn=False (skips its HBM writeback entirely).
    """
    B, H, Lq, D = query.shape
    Lk = key.shape[-2]
    out_dtype = query.dtype
    has_dropout = dropout_rate > 0.0
    keep_prob = 1.0 - float(dropout_rate)
    if approx_recip is None:
        # Exact reciprocal when p_attn is returned (rows sum to 1 like torch);
        # approximate EUP reciprocal otherwise (free slot).
        approx_recip = not return_p_attn

    if mxu_dtype is not None:
        # Cast MXU operands in the wrapper: halves q/k/v HBM bytes and feeds the
        # bf16-native MXU.  Softmax / accumulation stay in f32.
        query = query.astype(mxu_dtype)
        key = key.astype(mxu_dtype)
        value = value.astype(mxu_dtype)

    vmem_limit, vmem_budget = _vmem_budgets()

    # --- mask: keep it un-broadcast over B/H in HBM; size-1 batch/head dims are
    # handled purely by the index_map so no H-fold (or B-fold) copy is made. ---
    mask = jnp.asarray(mask)
    while mask.ndim < 4:
        mask = mask[None]
    mB, mH = mask.shape[0], mask.shape[1]
    if mH not in (1, H) or mB not in (1, B):
        raise ValueError(f"mask shape {mask.shape} not broadcastable to "
                         f"{(B, H, Lq, Lk)}")
    mask = jnp.broadcast_to(mask, (mB, mH, Lq, Lk))   # no-op over B/H dims

    if group_size is None:
        group_size = _choose_group_size(
            B, H, Lq, Lk, D, query.dtype.itemsize,
            mask_per_head=(mH == H), has_dropout=has_dropout,
            p_itemsize=(jnp.dtype(p_dtype).itemsize if return_p_attn else 0),
            budget_bytes=vmem_budget)
    G = group_size
    if H % G != 0:
        raise ValueError(f"group_size={G} must divide H={H}")
    Hg = H // G

    mask_block = (1, G if mH == H else 1, Lq, Lk)
    mask_index = lambda b, h: ((b if mB == B else 0), (h if mH == H else 0), 0, 0)

    in_specs = [
        pl.BlockSpec((1, G, Lq, D), lambda b, h: (b, h, 0, 0)),
        pl.BlockSpec((1, G, Lk, D), lambda b, h: (b, h, 0, 0)),
        pl.BlockSpec((1, G, Lk, D), lambda b, h: (b, h, 0, 0)),
        pl.BlockSpec(mask_block, mask_index),
    ]
    inputs = [query, key, value, mask]

    if has_dropout:
        # Host-side keep mask (portable to interpret mode).  bf16 halves its
        # HBM bytes; the kernel upcasts to f32.
        # TODO(synk): int8 keep-mask would quarter the bytes; use the on-chip
        # HW PRNG (pltpu.prng_*) when interpret-mode support is not required.
        keep_mask = jax.random.bernoulli(
            jax.random.PRNGKey(dropout_seed), keep_prob, (B, H, Lq, Lk)
        ).astype(jnp.bfloat16)
        in_specs.append(pl.BlockSpec((1, G, Lq, Lk), lambda b, h: (b, h, 0, 0)))
        inputs.append(keep_mask)

    out_shapes = [jax.ShapeDtypeStruct((B, H, Lq, D), out_dtype)]
    out_specs = [pl.BlockSpec((1, G, Lq, D), lambda b, h: (b, h, 0, 0))]
    if return_p_attn:
        out_shapes.append(jax.ShapeDtypeStruct((B, H, Lq, Lk), p_dtype))
        out_specs.append(pl.BlockSpec((1, G, Lq, Lk), lambda b, h: (b, h, 0, 0)))

    kernel = functools.partial(
        _attn_kernel,
        temperature=float(temperature),
        keep_prob=keep_prob if has_dropout else 1.0,
        return_p=bool(return_p_attn),
        approx_recip=bool(approx_recip),
    )

    results = pl.pallas_call(
        kernel,
        out_shape=tuple(out_shapes),
        grid_spec=pltpu.PrefetchScalarGridSpec(
            num_scalar_prefetch=0,
            grid=(B, Hg),                  # head-group axis fastest -> mask reuse
            in_specs=in_specs,
            out_specs=out_specs,
        ),
        compiler_params=pltpu.CompilerParams(
            # Both grid axes independent -> megacore sharding on v7x.
            dimension_semantics=("parallel", "parallel"),
            vmem_limit_bytes=vmem_limit,   # per-generation, with headroom
        ),
    )(*inputs)

    if return_p_attn:
        out, p_attn = results
        return out, p_attn
    (out,) = results
    return out, None


def _reference(query, key, value, mask, temperature):
    attn = jnp.matmul(query, jnp.swapaxes(key, -2, -1)) / temperature
    attn = attn + mask
    p = jax.nn.softmax(attn, axis=-1)
    return jnp.matmul(p, value), p


if __name__ == "__main__":
    B, H, Lq, Lk, D = 2, 4, 8, 8, 32
    temperature = float(D) ** 0.5

    key0 = jax.random.PRNGKey(0)
    kq, kk, kv, km = jax.random.split(key0, 4)
    query = jax.random.normal(kq, (B, H, Lq, D), dtype=jnp.float32)
    key_ = jax.random.normal(kk, (B, H, Lk, D), dtype=jnp.float32)
    value = jax.random.normal(kv, (B, H, Lk, D), dtype=jnp.float32)
    # additive mask (0 / -1e9), shared across heads (NOT broadcast in HBM)
    mask_bits = jax.random.bernoulli(km, 0.8, (B, 1, Lq, Lk))
    mask = jnp.where(mask_bits, 0.0, -1e9).astype(jnp.float32)

    ref_out, ref_p = _reference(query, key_, value, mask, temperature)

    # --- f32 path, exact reciprocal, no dropout: strict correctness check ---
    out, p_attn = self_attention(query, key_, value, mask,
                                 temperature=temperature, dropout_rate=0.0)
    jax.block_until_ready((out, p_attn))
    assert jnp.allclose(out, ref_out, atol=1e-4, rtol=1e-4)
    assert jnp.allclose(p_attn, ref_p, atol=1e-4, rtol=1e-4)

    # --- p_attn dropped entirely (inference path, approx reciprocal) ---
    out_np, p_none = self_attention(query, key_, value, mask,
                                    temperature=temperature, dropout_rate=0.0,
                                    return_p_attn=False)
    jax.block_until_ready(out_np)
    assert p_none is None
    assert jnp.allclose(out_np, ref_out, atol=1e-2, rtol=1e-2)

    # --- bf16-MXU path: relaxed tolerance ---
    out_bf, p_bf = self_attention(query, key_, value, mask,
                                  temperature=temperature, dropout_rate=0.0,
                                  mxu_dtype=jnp.bfloat16)
    jax.block_until_ready((out_bf, p_bf))
    assert jnp.allclose(out_bf, ref_out, atol=1e-1, rtol=1e-1)
    assert jnp.allclose(p_bf, ref_p, atol=1e-1, rtol=1e-1)

    # --- training-mode dropout path: sanity checks (RNG differs from torch) ---
    out_d, p_d = self_attention(query, key_, value, mask,
                                temperature=temperature, dropout_rate=0.1,
                                dropout_seed=123)
    jax.block_until_ready((out_d, p_d))
    assert out_d.shape == out.shape and p_d.shape == p_attn.shape
    assert bool(jnp.all(jnp.isfinite(out_d))) and bool(jnp.all(jnp.isfinite(p_d)))
    # some previously-nonzero attention probabilities must have been dropped
    assert bool(jnp.any((ref_p > 1e-3) & (p_d == 0.0)))

    print("KERNEL_OK")
</pallas_src>

<mosaic_0001>
module attributes {stable_mosaic.version = 11 : i64} {
  func.func @_attn_kernel(%arg0: i32, %arg1: i32, %arg2: memref<1x2x8x32xf32, #tpu.memory_space<vmem>>, %arg3: memref<1x2x8x32xf32, #tpu.memory_space<vmem>>, %arg4: memref<1x2x8x32xf32, #tpu.memory_space<vmem>>, %arg5: memref<1x1x8x8xf32, #tpu.memory_space<vmem>>, %arg6: memref<1x2x8x32xf32, #tpu.memory_space<vmem>>, %arg7: memref<1x2x8x8xf32, #tpu.memory_space<vmem>>) attributes {dimension_semantics = [#tpu.dimension_semantics<parallel>, #tpu.dimension_semantics<parallel>], iteration_bounds = array<i64: 2, 2>, scalar_prefetch = 0 : i64, scratch_operands = 0 : i64, tpu.core_type = #tpu.core_type<tc>, window_params = [{transform_indices = @transform_0, window_bounds = array<i64: 1, 2, 8, 32>}, {transform_indices = @transform_1, window_bounds = array<i64: 1, 2, 8, 32>}, {transform_indices = @transform_2, window_bounds = array<i64: 1, 2, 8, 32>}, {transform_indices = @transform_3, window_bounds = array<i64: 1, 1, 8, 8>}, {transform_indices = @transform_4, window_bounds = array<i64: 1, 2, 8, 32>}, {transform_indices = @transform_5, window_bounds = array<i64: 1, 2, 8, 8>}]} {
    %c0 = arith.constant 0 : index
    %c0_0 = arith.constant 0 : index
    %c0_1 = arith.constant 0 : index
    %c0_2 = arith.constant 0 : index
    %0 = vector.load %arg2[%c0, %c0_0, %c0_1, %c0_2] : memref<1x2x8x32xf32, #tpu.memory_space<vmem>>, vector<1x2x8x32xf32>
    %1 = vector.shape_cast %0 : vector<1x2x8x32xf32> to vector<2x8x32xf32>
    %cst = arith.constant 0.176776692 : f32
    %2 = vector.broadcast %cst : f32 to vector<2x8x32xf32>
    %3 = arith.mulf %1, %2 : vector<2x8x32xf32>
    %c0_3 = arith.constant 0 : index
    %c0_4 = arith.constant 0 : index
    %c0_5 = arith.constant 0 : index
    %c0_6 = arith.constant 0 : index
    %4 = vector.load %arg3[%c0_3, %c0_4, %c0_5, %c0_6] : memref<1x2x8x32xf32, #tpu.memory_space<vmem>>, vector<1x2x8x32xf32>
    %5 = vector.shape_cast %4 : vector<1x2x8x32xf32> to vector<2x8x32xf32>
    %c0_7 = arith.constant 0 : index
    %c0_8 = arith.constant 0 : index
    %c0_9 = arith.constant 0 : index
    %c0_10 = arith.constant 0 : index
    %6 = vector.load %arg4[%c0_7, %c0_8, %c0_9, %c0_10] : memref<1x2x8x32xf32, #tpu.memory_space<vmem>>, vector<1x2x8x32xf32>
    %7 = vector.shape_cast %6 : vector<1x2x8x32xf32> to vector<2x8x32xf32>
    %c0_11 = arith.constant 0 : index
    %c0_12 = arith.constant 0 : index
    %c0_13 = arith.constant 0 : index
    %c0_14 = arith.constant 0 : index
    %8 = vector.load %arg5[%c0_11, %c0_12, %c0_13, %c0_14] : memref<1x1x8x8xf32, #tpu.memory_space<vmem>>, vector<1x1x8x8xf32>
    %9 = vector.shape_cast %8 : vector<1x1x8x8xf32> to vector<1x8x8xf32>
    "tpu.trace_start"() <{level = 10 : i32, message = "gqd,gkd->gqk"}> : () -> ()
    %cst_15 = arith.constant dense<0.000000e+00> : vector<2x8x8xf32>
    %10 = tpu.matmul %3, %5, %cst_15 {dimension_numbers = #tpu.dot_dimension_numbers<[2], [2], [1], [1], [0, 0, 0, 1, 1, 1], [0], [0]>} : vector<2x8x32xf32>, vector<2x8x32xf32>, vector<2x8x8xf32> -> vector<2x8x8xf32>
    "tpu.trace_stop"() : () -> ()
    %11 = vector.broadcast %9 : vector<1x8x8xf32> to vector<2x8x8xf32>
    %12 = arith.addf %10, %11 : vector<2x8x8xf32>
    %cst_16 = arith.constant dense<0xFF800000> : vector<2x8xf32>
    %13 = vector.multi_reduction <maximumf>, %12, %cst_16 [2] : vector<2x8x8xf32> to vector<2x8xf32>
    %14 = vector.shape_cast %13 : vector<2x8xf32> to vector<2x8x1xf32>
    %15 = vector.broadcast %14 : vector<2x8x1xf32> to vector<2x8x8xf32>
    %16 = arith.subf %12, %15 : vector<2x8x8xf32>
    %17 = math.exp %16 : vector<2x8x8xf32>
    %cst_17 = arith.constant dense<0.000000e+00> : vector<2x8xf32>
    %18 = vector.multi_reduction <add>, %17, %cst_17 [2] : vector<2x8x8xf32> to vector<2x8xf32>
    %19 = vector.shape_cast %18 : vector<2x8xf32> to vector<2x8x1xf32>
    %20 = tpu.reciprocal %19 : vector<2x8x1xf32> -> vector<2x8x1xf32>
    %21 = vector.broadcast %20 : vector<2x8x1xf32> to vector<2x8x8xf32>
    %22 = arith.mulf %17, %21 : vector<2x8x8xf32>
    %c0_18 = arith.constant 0 : index
    %c0_19 = arith.constant 0 : index
    %c0_20 = arith.constant 0 : index
    %c0_21 = arith.constant 0 : index
    %23 = vector.load %arg7[%c0_18, %c0_19, %c0_20, %c0_21] : memref<1x2x8x8xf32, #tpu.memory_space<vmem>>, vector<1x2x8x8xf32>
    %24 = vector.shape_cast %23 : vector<1x2x8x8xf32> to vector<2x8x8xf32>
    %25 = vector.shape_cast %22 : vector<2x8x8xf32> to vector<1x2x8x8xf32>
    tpu.vector_store %arg7[%c0_18, %c0_19, %c0_20, %c0_21], %25 {strides = array<i32>} : memref<1x2x8x8xf32, #tpu.memory_space<vmem>>, vector<1x2x8x8xf32>,
    "tpu.trace_start"() <{level = 10 : i32, message = "gqk,gkd->gqd"}> : () -> ()
    %cst_22 = arith.constant dense<0.000000e+00> : vector<2x8x32xf32>
    %26 = tpu.matmul %22, %7, %cst_22 {dimension_numbers = #tpu.dot_dimension_numbers<[2], [1], [1], [2], [0, 0, 0, 1, 1, 2], [0], [0]>} : vector<2x8x8xf32>, vector<2x8x32xf32>, vector<2x8x32xf32> -> vector<2x8x32xf32>
    "tpu.trace_stop"() : () -> ()
    %c0_23 = arith.constant 0 : index
    %c0_24 = arith.constant 0 : index
    %c0_25 = arith.constant 0 : index
    %c0_26 = arith.constant 0 : index
    %27 = vector.load %arg6[%c0_23, %c0_24, %c0_25, %c0_26] : memref<1x2x8x32xf32, #tpu.memory_space<vmem>>, vector<1x2x8x32xf32>
    %28 = vector.shape_cast %27 : vector<1x2x8x32xf32> to vector<2x8x32xf32>
    %29 = vector.shape_cast %26 : vector<2x8x32xf32> to vector<1x2x8x32xf32>
    tpu.vector_store %arg6[%c0_23, %c0_24, %c0_25, %c0_26], %29 {strides = array<i32>} : memref<1x2x8x32xf32, #tpu.memory_space<vmem>>, vector<1x2x8x32xf32>,
    return
  }
  func.func @transform_0(%arg0: i32, %arg1: i32) -> (i32, i32, i32, i32) {
    %c0_i32 = arith.constant 0 : i32
    %c0_i32_0 = arith.constant 0 : i32
    %c0_i32_1 = arith.constant 0 : i32
    return %arg0, %arg1, %c0_i32, %c0_i32_0 : i32, i32, i32, i32
  }
  func.func @transform_1(%arg0: i32, %arg1: i32) -> (i32, i32, i32, i32) {
    %c0_i32 = arith.constant 0 : i32
    %c0_i32_0 = arith.constant 0 : i32
    %c0_i32_1 = arith.constant 0 : i32
    return %arg0, %arg1, %c0_i32, %c0_i32_0 : i32, i32, i32, i32
  }
  func.func @transform_2(%arg0: i32, %arg1: i32) -> (i32, i32, i32, i32) {
    %c0_i32 = arith.constant 0 : i32
    %c0_i32_0 = arith.constant 0 : i32
    %c0_i32_1 = arith.constant 0 : i32
    return %arg0, %arg1, %c0_i32, %c0_i32_0 : i32, i32, i32, i32
  }
  func.func @transform_3(%arg0: i32, %arg1: i32) -> (i32, i32, i32, i32) {
    %c0_i32 = arith.constant 0 : i32
    %c0_i32_0 = arith.constant 0 : i32
    %c0_i32_1 = arith.constant 0 : i32
    %c0_i32_2 = arith.constant 0 : i32
    return %arg0, %c0_i32, %c0_i32_0, %c0_i32_1 : i32, i32, i32, i32
  }
  func.func @transform_4(%arg0: i32, %arg1: i32) -> (i32, i32, i32, i32) {
    %c0_i32 = arith.constant 0 : i32
    %c0_i32_0 = arith.constant 0 : i32
    %c0_i32_1 = arith.constant 0 : i32
    return %arg0, %arg1, %c0_i32, %c0_i32_0 : i32, i32, i32, i32
  }
  func.func @transform_5(%arg0: i32, %arg1: i32) -> (i32, i32, i32, i32) {
    %c0_i32 = arith.constant 0 : i32
    %c0_i32_0 = arith.constant 0 : i32
    %c0_i32_1 = arith.constant 0 : i32
    return %arg0, %arg1, %c0_i32, %c0_i32_0 : i32, i32, i32, i32
  }
}

</mosaic_0001>

<bundles_post_ra>
// kernel: tpu_custom_call.1
= control target key start
LH: loop header
LB: loop body
LE: loop exit
PB: predicated region body
PF: predicated region fallthrough
CT: control target
= control target key end

     0   :  { %s1985_s0 = inlined_call_operand.hbm [shape: f32[2,4,8,32], index: 0, kind: input, shape index: {}]   ;;  %s1986_s1 = inlined_call_operand.hbm [shape: f32[2,4,8,32], index: 1, kind: input, shape index: {}]   ;;  %s1987_s2 = inlined_call_operand.hbm [shape: f32[2,4,8,32], index: 2, kind: input, shape index: {}]   ;;  %s1988_s3 = inlined_call_operand.hbm [shape: f32[2,1,8,8], index: 3, kind: input, shape index: {}]   ;;  %s1989_s4 = inlined_call_operand.hbm [shape: f32[2,4,8,32], index: 4, kind: output, shape index: {0}]   ;;  %s1990_s5 = inlined_call_operand.hbm [shape: f32[2,4,8,8], index: 5, kind: output, shape index: {1}]  }
   0x1   :  { %2006 = sst [smem:[#allocation24_spill]] %s1986_s1 }
   0x2   :  { %2007 = sst [smem:[#allocation25_spill]] %s1989_s4 }
   0x3   :  { %2008 = sst [smem:[#allocation26_spill]] %s1990_s5 }
   0x4   :  { %11 = vsyncpa [#allocation3], 0 }
   0x5   :  { %13 = vsyncpa [#allocation3 + $0x1], 0 }
   0x6   :  { %14 = vsyncpa [#allocation6], 0 }
   0x7   :  { %16 = vsyncpa [#allocation6 + $0x1], 0 }
   0x8   :  { %17 = vsyncpa [#allocation9], 0 }
   0x9   :  { %19 = vsyncpa [#allocation9 + $0x1], 0 }
   0xa   :  { %20 = vsyncpa [#allocation4], 0 }
   0xb   :  { %22 = vsyncpa [#allocation4 + $0x1], 0 }
   0xc   :  { %23 = vsyncpa [#allocation12], 0 }
   0xd   :  { %25 = vsyncpa [#allocation12 + $0x1], 0  ;;  %s1503_s18 = smov 0   ;;  %s1505_s19 = smov 0  }
   0xe   :  { %s1507_s20 = smov 0   ;;  %s1509_s21 = smov 0  }
   0xf   :  { %s1511_s22 = smov 0   ;;  %s1513_s23 = smov 0  }
  0x10   :  { %s1515_s24 = smov 0   ;;  %s1517_s25 = smov 0  }
  0x11   :  { %s1519_s26 = smov 0   ;;  %s1521_s27 = smov 0  }
  0x12   :  { %s1523_s28 = smov 0  }
  0x13 LB: > { %2009 = sst [smem:[#allocation18_spill]] %s1443_s24  ;;  %s40_s29 = sadd.s32 1, %s1451_s26  ;;  %s1459_s28 = sphi %s1523_s28, %s31_s28   ;;  %s1455_s27 = sphi %s1521_s27, %s2054_s27   ;;  %s1451_s26 = sphi %s1519_s26, %s2045_s26   ;;  %s1447_s25 = sphi %s1517_s25, %s2053_s25   ;;  %s1443_s24 = sphi %s1515_s24, %s2044_s24   ;;  %s1439_s23 = sphi %s1513_s23, %s2052_s23   ;;  %s1435_s22 = sphi %s1511_s22, %s2051_s22   ;;  %s1431_s21 = sphi %s1509_s21, %s2050_s21   ;;  %s1427_s20 = sphi %s1507_s20, %s2049_s20   ;;  %s1423_s19 = sphi %s1505_s19, %s2048_s19   ;;  %s1419_s18 = sphi %s1503_s18, %s2047_s18  }
  0x14   : > { %2010 = sst [smem:[#allocation19_spill]] %s1447_s25  ;;  %s43_s30 = sadd.s32 1, %s1455_s27 }
  0x15   : > { %2011 = sst [smem:[#allocation20_spill]] %s1451_s26  ;;  %p41_p0 = scmp.ge.s32.totalorder %s40_s29, 2 }
  0x16   : > { %s52_s6 = sadd.s32 1, %s1439_s23  ;;  %p1997_p1 = scmp.ne.s32.totalorder %s1439_s23, %s1435_s22 }
  0x17   : > { %p1998_p2 = scmp.eq.s32.totalorder %s1459_s28, 0  ;;  %s2056_s29 = smov (%p41_p0, %s40_s29), 0 }
  0x18   : > { %2012 = sst [smem:[#allocation21_spill]] %s2056_s29  ;;  %s2058_s30 = smov (!%p41_p0, %s43_s30), %s1455_s27 }
  0x19   : > { %s48_s7 = ssub.s32 %s1451_s26, %s2056_s29  ;;  %p1574_p3 = por %p1998_p2, %p1997_p1 }
  0x1a   : > { %p45_p4 = scmp.ge.s32.totalorder %s2058_s30, 2  ;;  %p1996_p5 = scmp.lt.s32.totalorder %s1459_s28, 4 }
  0x1b   : > { %s1991_s9 = sand.u32 1, %s1439_s23   ;;  %s977_s11 = sshll.u32 %s1451_s26, 1 }
  0x1c   : > { %s2060_s30 = smov (%p45_p4, %s2058_s30), 0  ;;  %s1584_s10 = sshll.u32 %s1991_s9, 4 }
  0x1d   : > { %2014 = sst [smem:[#allocation22_spill]] %s2060_s30  ;;  %s1589_s12 = ssub.s32 %s1455_s27, %s2060_s30 }
  0x1e   : > { %s978_s13 = sshll.u32 %s1455_s27, 2  ;;  %s49_s14 = sor.u32 %s48_s7, %s1589_s12 }
  0x1f   : > { %s237_s15 = sadd.s32 %s978_s13, %s977_s11  ;;  %p50_p6 = scmp.eq.s32.totalorder %s49_s14, 0 }
  0x20   : > { %s1593_s16 = sshll.u32 %s237_s15, 7  ;;  %p1599_p7 = pnand %p1996_p5, %p1574_p3 }
  0x21   : > { %s1604_s9 = scalar_select %p50_p6, %s1439_s23, %s52_s6  }
  0x22   : > { %s250_s29 = sand.u32 1, %s1459_s28   ;;  %s2017_s1 = sld [smem:[#allocation24_spill]] }
  0x23   : > { %2016 = sst [smem:[#allocation23_spill]] %s1604_s9  ;;  %s254_s7 = scalar_lea.vmem [#allocation5], %s1584_s10 }
  0x24   : > { %s263_s8 = sshll.u32 %s254_s7, 4  ;;  %s1618_s11 = scalar_lea.sflag [#allocation6], %s250_s29  ;;  %s1615_s8 = int_to_ptr.vmem [resolvable:$true] %s263_s8 }
  0x25   : > { %p1624_p11 = pneg %p1599_p7 }
  0x28   : > { %s1611_s4 = scalar_lea.hbm %s2017_s1, %s1593_s16  ;;  %s1182_s14 = scalar_lea.hbm %s2017_s1, 1024 }
  0x29   : > { %s1177_s6 = scalar_lea.hbm %s1611_s4, 256  ;;  %p1183_p0 = scmp.lt.u32.totalorder %s1611_s4, %s2017_s1 }
  0x2a   : > { %p1178_p10 = scmp.ne.s32.totalorder %s1611_s4, %s1177_s6  ;;  %p1184_p3 = scmp.lt.u32.totalorder %s1182_s14, %s1177_s6 }
  0x2b   : > { %p1186_p6 = scmp.lt.u32.totalorder %s1177_s6, %s1611_s4 }
  0x2c   : > { %p1180_p12 = pnand %p1624_p11, %p1178_p10  ;;  %p1185_p4 = por %p1184_p3, %p1183_p0 }
  0x2e   : > { %p1181_p13 = pneg %p1180_p12  ;;  %p1187_p5 = por %p1186_p6, %p1185_p4 }
  0x30   : > { %p1188_p1 = pnand %p1187_p5, %p1181_p13 }
  0x32   : > { %1191 = shalt.err (!%p1188_p1)
}
  0x33   : > { %s1192_s29 = scalar_lea.vmem %s1615_s8, 256  ;;  %s1461_s26 = smov [#allocation5]  }
  0x34   : > { %p1193_p10 = scmp.ne.s32.totalorder %s1615_s8, %s1192_s29  ;;  %s1197_s30 = sshll.u32 %s1461_s26, 4  ;;  %s1198_s30 = int_to_ptr.vmem [resolvable:$false] %s1197_s30 }
  0x35   : > { %s1199_s15 = scalar_lea.vmem %s1198_s30, 512  ;;  %p1200_p8 = scmp.lt.s32.totalorder %s1615_s8, %s1198_s30 }
  0x36   : > { %p1195_p12 = pnand %p1193_p10, %p1624_p11  ;;  %p1201_p9 = scmp.lt.s32.totalorder %s1199_s15, %s1192_s29 }
  0x38   : > { %p1196_p2 = pneg %p1195_p12  ;;  %p1202_p0 = por %p1201_p9, %p1200_p8 }
  0x3a   : > { %p1203_p3 = pnand %p1202_p0, %p1196_p2 }
  0x3c   : > { %1206 = shalt.err (!%p1203_p3)
}
  0x3d   : > { %s1999_s6 = smov 128   ;;  %s2001_s14 = smov 8  }
  0x3e   : > { %1059 = dma.hbm_to_vmem [thread:$0]  (!%p1599_p7), %s1611_s4, 256, %s1615_s8, %s1618_s11, %s1999_s6, %s1999_s6, %s2001_s14  }
  0x3f   : > { %p2019_p1 = scmp.lt.s32.totalorder %s1459_s28, 5  ;;  %p2020_p2 = scmp.ge.s32.totalorder %s1459_s28, 1 }
  0x40   : > { %s1663_s30 = scalar_lea.hbm %s1985_s0, %s1593_s16  ;;  %s231_s15 = scalar_lea.vmem [#allocation2], %s1584_s10 }
  0x41   : > { %p1655_p5 = pnand %p2020_p2, %p2019_p1  ;;  %s240_s1 = sshll.u32 %s231_s15, 4  ;;  %s1666_s1 = int_to_ptr.vmem [resolvable:$true] %s240_s1 }
  0x42   : > { %s1672_s6 = scalar_lea.hbm %s1987_s2, %s1593_s16  ;;  %s2022_s14 = sand.u32 1, %s1439_s23  }
  0x43   : > { %s2021_s7 = scalar_select %p1655_p5, 1, 0 }
  0x44   : > { %s1676_s9 = scalar_lea.sflag [#allocation3], %s2022_s14  ;;  %s1207_s5 = scalar_lea.hbm %s1663_s30, 256 }
  0x45   : > { %p1208_p8 = scmp.ne.s32.totalorder %s1663_s30, %s1207_s5  ;;  %s1212_s25 = scalar_lea.hbm %s1985_s0, 1024 }
  0x46   : > { %p1213_p4 = scmp.lt.u32.totalorder %s1663_s30, %s1985_s0  ;;  %p1214_p6 = scmp.lt.u32.totalorder %s1212_s25, %s1207_s5 }
  0x47   : > { %p1210_p9 = pnand %p1208_p8, %p1624_p11  ;;  %p1216_p12 = scmp.lt.u32.totalorder %s1207_s5, %s1663_s30 }
  0x48   : > { %p1215_p10 = por %p1214_p6, %p1213_p4 }
  0x49   : > { %p1211_p13 = pneg %p1210_p9 }
  0x4a   : > { %p1217_p0 = por %p1216_p12, %p1215_p10 }
  0x4c   : > { %p1218_p3 = pnand %p1217_p0, %p1211_p13 }
  0x4e   : > { %1221 = shalt.err (!%p1218_p3)
}
  0x4f   : > { %s1222_s16 = scalar_lea.vmem %s1666_s1, 256  ;;  %s1464_s14 = smov [#allocation2]  }
  0x50   : > { %p1223_p1 = scmp.ne.s32.totalorder %s1666_s1, %s1222_s16  ;;  %s1227_s4 = sshll.u32 %s1464_s14, 4  ;;  %s1228_s4 = int_to_ptr.vmem [resolvable:$false] %s1227_s4 }
  0x51   : > { %s1229_s24 = scalar_lea.vmem %s1228_s4, 512  ;;  %p1230_p9 = scmp.lt.s32.totalorder %s1666_s1, %s1228_s4 }
  0x52   : > { %p1225_p2 = pnand %p1223_p1, %p1624_p11  ;;  %p1231_p5 = scmp.lt.s32.totalorder %s1229_s24, %s1222_s16 }
  0x54   : > { %p1226_p8 = pneg %p1225_p2  ;;  %p1232_p4 = por %p1231_p5, %p1230_p9 }
  0x56   : > { %p1233_p6 = pnand %p1232_p4, %p1226_p8 }
  0x58   : > { %1236 = shalt.err (!%p1233_p6)
}
  0x59   : > { %s2023_s5 = smov 8   ;;  %s2024_s25 = smov 128  }
  0x5a   : > { %1056 = dma.hbm_to_vmem [thread:$0]  (!%p1599_p7), %s1663_s30, 256, %s1666_s1, %s1676_s9, %s2024_s25, %s2024_s25, %s2023_s5  }
  0x5b   : > { %s277_s8 = scalar_lea.vmem [#allocation7], %s1584_s10  ;;  %s1237_s26 = scalar_lea.hbm %s1672_s6, 256 }
  0x5c   : > { %s286_s29 = sshll.u32 %s277_s8, 4  ;;  %p1238_p5 = scmp.ne.s32.totalorder %s1672_s6, %s1237_s26  ;;  %s1704_s29 = int_to_ptr.vmem [resolvable:$true] %s286_s29 }
  0x5d   : > { %s1242_s14 = scalar_lea.hbm %s1987_s2, 1024  ;;  %p1243_p12 = scmp.lt.u32.totalorder %s1672_s6, %s1987_s2 }
  0x5e   : > { %p1240_p13 = pnand %p1238_p5, %p1624_p11  ;;  %p1244_p0 = scmp.lt.u32.totalorder %s1242_s14, %s1237_s26 }
  0x5f   : > { %p1246_p1 = scmp.lt.u32.totalorder %s1237_s26, %s1672_s6 }
  0x60   : > { %p1241_p10 = pneg %p1240_p13  ;;  %p1245_p3 = por %p1244_p0, %p1243_p12 }
  0x62   : > { %p1247_p2 = por %p1246_p1, %p1245_p3 }
  0x64   : > { %p1248_p8 = pnand %p1247_p2, %p1241_p10 }
  0x66   : > { %1251 = shalt.err (!%p1248_p8)
}
  0x67   : > { %s1252_s1 = scalar_lea.vmem %s1704_s29, 256  ;;  %s1465_s9 = smov [#allocation7]  }
  0x68   : > { %p1253_p9 = scmp.ne.s32.totalorder %s1704_s29, %s1252_s1  ;;  %s1257_s10 = sshll.u32 %s1465_s9, 4  ;;  %s1258_s10 = int_to_ptr.vmem [resolvable:$false] %s1257_s10 }
  0x69   : > { %s1259_s30 = scalar_lea.vmem %s1258_s10, 512  ;;  %p1260_p5 = scmp.lt.s32.totalorder %s1704_s29, %s1258_s10 }
  0x6a   : > { %p1255_p4 = pnand %p1253_p9, %p1624_p11  ;;  %p1261_p13 = scmp.lt.s32.totalorder %s1259_s30, %s1252_s1 }
  0x6c   : > { %p1256_p6 = pneg %p1255_p4  ;;  %p1262_p12 = por %p1261_p13, %p1260_p5 }
  0x6e   : > { %p1263_p0 = pnand %p1262_p12, %p1256_p6 }
  0x70   : > { %1266 = shalt.err (!%p1263_p0)
}
  0x71   : > { %1062 = dma.hbm_to_vmem [thread:$0]  (!%p1599_p7), %s1672_s6, 256, %s1704_s29, %s1618_s11, %s2024_s25, %s2024_s25, %s2023_s5  }
  0x72   : > { %s1732_s17 = sadd.s32 4294967295, %s1459_s28   ;;  %s973_s13 = sadd.s32 4294967294, %s1459_s28  }
  0x73   : > { %p65_p11 = scmp.ne.s32.totalorder %s1435_s22, %s1431_s21  ;;  %p66_p10 = scmp.eq.s32.totalorder %s1732_s17, 0 }
  0x74   : > { %p132_p3 = scmp.eq.s32.totalorder %s1589_s12, 0  ;;  %s134_s8 = sadd.s32 1, %s1427_s20 }
  0x75   : > { %p1743_p1 = por %p66_p10, %p65_p11  ;;  %p141_p7 = scmp.ne.s32.totalorder %s1427_s20, %s1423_s19 }
  0x76   : > { %s1750_s11 = scalar_select %p132_p3, %s1427_s20, %s134_s8  }
  0x77   : > { %p2026_p2 = scmp.eq.s32.totalorder %s1459_s28, 0  ;;  %p147_p9 = scmp.ne.s32.totalorder %s1423_s19, %s1419_s18 }
  0x78   : > { %p173_p4 = scmp.eq.s32.totalorder %s1732_s17, 3  ;;  %p179_p6 = scmp.eq.s32.totalorder %s973_s13, 3 }
  0x79   : > { %p1754_p8 = por %p141_p7, %p2026_p2  ;;  %p1761_p5 = por %p147_p9, %p66_p10 }
  0x7a   : > { %s296_s5 = sand.u32 1, %s1427_s20   ;;  %p2029_p13 = scmp.ne.s32.totalorder %s1439_s23, %s1435_s22 }
  0x7b   : > { %s2028_s12 = scalar_select %p1761_p5, 1, 0 }
  0x7c   : > { %p1769_p12 = por %p173_p4, %p2029_p13  ;;  %p1776_p0 = por %p179_p6, %p65_p11 }
  0x7d   : > { %s988_s15 = sshll.u32 %s296_s5, 3  ;;  %s989_s16 = sshll.u32 %s1455_s27, 7 }
  0x7e   : > { %s2030_s25 = scalar_select %p1769_p12, 1, 0 }
  0x7f   : > { %s2031_s29 = scalar_select %p1776_p0, 1, 0 }
  0x80   : > { %s1784_s4 = scalar_lea.hbm %s1988_s3, %s989_s16  ;;  %s300_s24 = scalar_lea.vmem [#allocation8], %s988_s15 }
  0x81   : > { %s307_s1 = sshll.u32 %s300_s24, 4  ;;  %p2032_p11 = scmp.lt.s32.totalorder %s1459_s28, 4  ;;  %s1786_s1 = int_to_ptr.vmem [resolvable:$true] %s307_s1 }
  0x82   : > { %s297_s10 = scalar_lea.sflag [#allocation9], %s296_s5  ;;  %s1267_s30 = scalar_lea.hbm %s1784_s4, 128 }
  0x83   : > { %p1792_p10 = pnand %p2032_p11, %p1754_p8  ;;  %p1268_p3 = scmp.ne.s32.totalorder %s1784_s4, %s1267_s30 }
  0x84   : > { %s1272_s6 = scalar_lea.hbm %s1988_s3, 256  ;;  %p1273_p8 = scmp.lt.u32.totalorder %s1784_s4, %s1988_s3 }
  0x85   : > { %p1269_p7 = pneg %p1792_p10  ;;  %p1274_p4 = scmp.lt.u32.totalorder %s1272_s6, %s1267_s30 }
  0x86   : > { %p1276_p13 = scmp.lt.u32.totalorder %s1267_s30, %s1784_s4 }
  0x87   : > { %p1270_p2 = pnand %p1269_p7, %p1268_p3  ;;  %p1275_p6 = por %p1274_p4, %p1273_p8 }
  0x89   : > { %p1271_p9 = pneg %p1270_p2  ;;  %p1277_p11 = por %p1276_p13, %p1275_p6 }
  0x8b   : > { %p1278_p0 = pnand %p1277_p11, %p1271_p9 }
  0x8d   : > { %1281 = shalt.err (!%p1278_p0)
}
  0x8e   : > { %s1282_s5 = scalar_lea.vmem %s1786_s1, 128  ;;  %s1466_s18 = smov [#allocation8]  }
  0x8f   : > { %p1283_p3 = scmp.ne.s32.totalorder %s1786_s1, %s1282_s5  ;;  %s1287_s14 = sshll.u32 %s1466_s18, 4  ;;  %s1288_s14 = int_to_ptr.vmem [resolvable:$false] %s1287_s14 }
  0x90   : > { %s1289_s24 = scalar_lea.vmem %s1288_s14, 256  ;;  %p1290_p5 = scmp.lt.s32.totalorder %s1786_s1, %s1288_s14 }
  0x91   : > { %p1285_p2 = pnand %p1283_p3, %p1269_p7  ;;  %p1291_p8 = scmp.lt.s32.totalorder %s1289_s24, %s1282_s5 }
  0x93   : > { %p1286_p12 = pneg %p1285_p2  ;;  %p1292_p4 = por %p1291_p8, %p1290_p5 }
  0x95   : > { %p1293_p6 = pnand %p1292_p4, %p1286_p12 }
  0x97   : > { %1296 = shalt.err (!%p1293_p6)
}
  0x98   : > { %1065 = dma.hbm_to_vmem [thread:$0]  (!%p1792_p10), %s1784_s4, 128, %s1786_s1, %s297_s10  }
  0x99   : > { %p2034_p0 = scmp.ne.s32.totalorder %s2021_s7, 0 }
  0x9a   : > { %s1824_s30 = sand.u32 (!%p2034_p0), 1, %s1435_s22  }
  0x9b   : > { %316 = sbr.rel (%p2034_p0) target bundleno = 935 (0x3a7), region = 36  ;;  %s1827_s13 = sshll.u32 (!%p2034_p0), %s1824_s30, 4 }
  0x9c   : > { %s319_s8 = scalar_lea.sflag (!%p2034_p0), [#allocation3], %s1824_s30  ;;  %s322_s6 = scalar_lea.vmem (!%p2034_p0), [#allocation2], %s1827_s13 }
  0xa2   : > { %1398 = dma.done.wait (%p1743_p1), %s319_s8, 256  }
  0xa3   : > { %1400 = vsyncadd (%p1743_p1), %s319_s8, 4294967040  ;;  %s327_s7 = sand.u32 1, %s1732_s17   ;;  %s331_s1 = scalar_lea.vmem [#allocation5], %s1827_s13 }
  0xa4   : > { %s328_s4 = scalar_lea.sflag [#allocation6], %s327_s7 }
  0xa5   : > { %1402 = dma.done.wait (%p1743_p1), %s328_s4, 512  }
  0xa6   : > { %1404 = vsyncadd (%p1743_p1), %s328_s4, 4294966784  ;;  %s345_s9 = sand.u32 1, %s1423_s19   ;;  %s340_s15 = scalar_lea.vmem [#allocation7], %s1827_s13 }
  0xa7   : > { %s994_s10 = sshll.u32 %s345_s9, 3  ;;  %s346_s16 = scalar_lea.sflag [#allocation9], %s345_s9 }
  0xa8   : > { %s349_s5 = scalar_lea.vmem [#allocation8], %s994_s10  ;;  %p2035_p5 = scmp.ne.s32.totalorder %s2028_s12, 0 }
  0xaa   : > { %1406 = dma.done.wait (%p2035_p5), %s346_s16, 128  }
  0xab   : > { %1408 = vsyncadd (%p2035_p5), %s346_s16, 4294967168  ;;  %v1467_v0 = vmov 0.0   ;;  %vm1468_vm0 = vmmov 0   ;;  %vm410_vm1 = vcmask 261120   ;;  %v405_v1 = vld [vmem:[%s331_s1] sm:$0xff]  ;;  %v406_v3 = vld [vmem:[%s331_s1 + $0x8] sm:$0xff] }
  0xac   : > { %1021 = vmatprep.subr.mxu0 %v1467_v0  ;;  %1023 = vmatprep.mubr.msk.f32.mxu0 %vm1468_vm0, %v1467_v0  ;;  %v401_v2 = vld [vmem:[%s322_s6] sm:$0xff]  ;;  %v402_v5 = vld [vmem:[%s322_s6 + $0x8] sm:$0xff]  ;;  %vm563_vm2 = vcmask 64512   ;;  %s2036_s17 = sld [smem:[#allocation18_spill]]  ;;  %s2037_s26 = sld [smem:[#allocation19_spill]] }
  0xad   : > { %1026 = vmatprep.subr.mxu1 %v1467_v0  ;;  %1028 = vmatprep.mubr.msk.f32.mxu1 %vm1468_vm0, %v1467_v0  ;;  %v403_v4 = vmul.f32 0.17677669, %v401_v2  ;;  %v404_v6 = vmul.f32 0.17677669, %v402_v5  ;;  %v409_v7 = vld [vmem:[%s349_s5] sm:$0xff]  ;;  %v408_v27 = vld [vmem:[%s340_s15 + $0x8] sm:$0xff] }
  0xae   : > { %1022 = vmatpush3.xpose.msk.msra.mxu0 %vm410_vm1, %v405_v1  ;;  %1027 = vmatpush3.xpose.msk.msra.mxu1 %vm410_vm1, %v406_v3  ;;  %v407_v26 = vld [vmem:[%s340_s15] sm:$0xff]  ;;  %s395_s12 = scalar_lea.vmem [#allocation11], %s1827_s13  ;;  %s2038_s1 = sld [smem:[#allocation26_spill]] }
  0xaf   : > { %1031 = vmatprep.subr.mxu0 %v1467_v0  ;;  %1036 = vmatprep.subr.mxu1 %v1467_v0  ;;  %s775_s6 = sshll.u32 %s395_s12, 4  ;;  %s742_s10 = scalar_lea.sflag [#allocation12], %s1824_s30  ;;  %s1880_s6 = int_to_ptr.vmem [resolvable:$true] %s775_s6 }
  0xb0   : > { %s1297_s15 = scalar_lea.vmem %s1880_s6, 256  ;;  %p2039_p12 = scmp.ne.s32.totalorder %s2030_s25, 0 }
  0xb1   : > { %1024 = vmatmul.mubr.msk.f32.vlgmr.msra.gmra.mrb[0].mxu0 %vm410_vm1, %v403_v4  ;;  %1029 = vmatmul.mubr.msk.f32.vlgmr.msra.gmra.mrb[0].mxu1 %vm410_vm1, %v404_v6  ;;  %p1298_p1 = scmp.ne.s32.totalorder %s1880_s6, %s1297_s15  ;;  %s1469_s16 = smov [#allocation11]  }
  0xb2   : > { %1033 = vmatprep.mubr.msk.f32.mxu0 %vm1468_vm0, %v1467_v0  ;;  %1038 = vmatprep.mubr.msk.f32.mxu1 %vm1468_vm0, %v1467_v0  ;;  %s1005_s18 = sshll.u32 %s2036_s17, 1  ;;  %s1006_s14 = sshll.u32 %s2037_s26, 2 }
  0xb3   : > { %1032 = vmatpush3.msra.mxu0 %v407_v26  ;;  %1037 = vmatpush3.msra.mxu1 %v408_v27  ;;  %s1870_s24 = sadd.s32 %s1006_s14, %s1005_s18  ;;  %p1299_p10 = pnand %p1298_p1, %p2039_p12 }
  0xb4   : > { %s1007_s8 = sshll.u32 %s1870_s24, 7  ;;  %s1301_s5 = sshll.u32 %s1469_s16, 4  ;;  %s1302_s5 = int_to_ptr.vmem [resolvable:$false] %s1301_s5 }
  0xb5   : > { %s1878_s9 = scalar_lea.hbm %s2038_s1, %s1007_s8  ;;  %p1300_p7 = pneg %p1299_p10 }
  0xb6   : > { %s1303_s17 = scalar_lea.vmem %s1302_s5, 512  ;;  %p1304_p9 = scmp.lt.s32.totalorder %s1880_s6, %s1302_s5 }
  0xb7   : > { %p1305_p13 = scmp.lt.s32.totalorder %s1303_s17, %s1297_s15 }
  0xb9   : > { %p1306_p11 = por %p1305_p13, %p1304_p9 }
  0xbb   : > { %p1307_p3 = pnand %p1306_p11, %p1300_p7 }
 0x184   : > { %v483_v8 = vpop.f32.mrb[0].mxu0  ;;  %v559_v9 = vpop.f32.mrb[0].mxu1 }
 0x185   : > { %v484_v10 = vadd.f32 %v483_v8, %v409_v7  ;;  %v1025_v11 = vpop.f32.mrb[1].mxu0  ;;  %v560_v12 = vadd.f32 %v559_v9, %v409_v7  ;;  %v1030_v13 = vpop.f32.mrb[1].mxu1 }
 0x187   : > { %v564_v14 = vsel %vm563_vm2, %v484_v10, -inf  ;;  %v567_v15 = vsel %vm563_vm2, %v560_v12, -inf }
 0x188   : > { %565 = vmax.xlane.f32.xlu0 %v564_v14 }
 0x18c   : > { %568 = vmax.xlane.f32.xlu0 %v567_v15 }
 0x215   : > { %v566_v16 = vpop.xlane.xlu0 %565 }
 0x216   : > { %v570_v17 = vsub.f32 %v484_v10, %v566_v16 }
 0x218   : > { %v572_v18 = vmul.f32 1.442695, %v570_v17 }
 0x219   : > { %v569_v19 = vpop.xlane.xlu0 %568 }
 0x21a   : > { %1169 = vpow2.f32 %v572_v18  ;;  %v571_v20 = vsub.f32 %v560_v12, %v569_v19 }
 0x21c   : > { %v574_v21 = vmul.f32 1.442695, %v571_v20 }
 0x21e   : > { %1171 = vpow2.f32 %v574_v21 }
 0x224   : > { %v1170_v22 = vpop.eup %1169 }
 0x225   : > { %v576_v23 = vsel %vm563_vm2, %v1170_v22, 0.0 }
 0x226   : > { %577 = vadd.xlane.f32.xlu1 %v576_v23 }
 0x228   : > { %v1172_v24 = vpop.eup %1171 }
 0x229   : > { %v579_v25 = vsel %vm563_vm2, %v1172_v24, 0.0 }
 0x22a   : > { %580 = vadd.xlane.f32.xlu1 %v579_v25 }
 0x2b3   : > { %v578_v28 = vpop.xlane.xlu1 %577 }
 0x2b4   : > { %1173 = vrcp.f32 %v578_v28 }
 0x2b7   : > { %v581_v29 = vpop.xlane.xlu1 %580 }
 0x2b8   : > { %1175 = vrcp.f32 %v581_v29 }
 0x2be   : > { %v1174_v30 = vpop.eup %1173 }
 0x2bf   : > { %v584_v31 = vmul.f32 %v1174_v30, %v1170_v22 }
 0x2c1   : > { %1034 = vmatmul.mubr.msk.f32.vlgmr.msra.gmra.mrb[2].mxu0 %vm563_vm2, %v584_v31  ;;  %586 = vst.msk [vmem:[%s395_s12] sm:$0xff] %vm563_vm2, %v584_v31 }
 0x2c2   : > { %v1176_v32 = vpop.eup %1175 }
 0x2c3   : > { %v585_v33 = vmul.f32 %v1176_v32, %v1172_v24 }
 0x2c5   : > { %1039 = vmatmul.mubr.msk.f32.vlgmr.msra.gmra.mrb[2].mxu1 %vm563_vm2, %v585_v33  ;;  %587 = vst.msk [vmem:[%s395_s12 + $0x8] sm:$0xff] %vm563_vm2, %v585_v33 }
 0x2c6   : > { %1310 = shalt.err (!%p1307_p3)
}
 0x2c7   : > { %s1311_s26 = scalar_lea.hbm %s1878_s9, 256  ;;  %s1315_s14 = scalar_lea.hbm %s2038_s1, 1024 }
 0x2c8   : > { %p1312_p2 = scmp.ne.s32.totalorder %s1878_s9, %s1311_s26  ;;  %p1316_p6 = scmp.lt.u32.totalorder %s1878_s9, %s2038_s1 }
 0x2c9   : > { %p1317_p0 = scmp.lt.u32.totalorder %s1315_s14, %s1311_s26  ;;  %p1319_p1 = scmp.lt.u32.totalorder %s1311_s26, %s1878_s9 }
 0x2ca   : > { %p1313_p8 = pnand %p1312_p2, %p2039_p12 }
 0x2cb   : > { %p1318_p5 = por %p1317_p0, %p1316_p6 }
 0x2cc   : > { %p1314_p4 = pneg %p1313_p8 }
 0x2cd   : > { %p1320_p10 = por %p1319_p1, %p1318_p5 }
 0x2cf   : > { %p1321_p7 = pnand %p1320_p10, %p1314_p4 }
 0x2d1   : > { %1324 = shalt.err (!%p1321_p7)
}
 0x2d2   : > { %s1470_s15 = smov 128   ;;  %s1471_s16 = smov 8  }
 0x2d3   : > { %1050 = dma.vmem_to_hbm [thread:$0]  (%p2039_p12), %s1880_s6, 256, %s1878_s9, %s742_s10, %s1470_s15, %s1470_s15, %s1471_s16  }
 0x2d4   : > { %s388_s5 = scalar_lea.vmem [#allocation10], %s1827_s13  ;;  %s2040_s18 = sld [smem:[#allocation25_spill]] }
 0x2d5   : > { %s757_s17 = sshll.u32 %s388_s5, 4  ;;  %s737_s13 = scalar_lea.sflag [#allocation4], %s1824_s30  ;;  %s1911_s17 = int_to_ptr.vmem [resolvable:$true] %s757_s17 }
 0x2d6   : > { %s1325_s6 = scalar_lea.vmem %s1911_s17, 256  ;;  %s1472_s9 = smov [#allocation10]  }
 0x2d7   : > { %p1326_p9 = scmp.ne.s32.totalorder %s1911_s17, %s1325_s6  ;;  %s1329_s24 = sshll.u32 %s1472_s9, 4  ;;  %s1330_s24 = int_to_ptr.vmem [resolvable:$false] %s1329_s24 }
 0x2d8   : > { %s1331_s10 = scalar_lea.vmem %s1330_s24, 512  ;;  %p1332_p3 = scmp.lt.s32.totalorder %s1911_s17, %s1330_s24 }
 0x2d9   : > { %p1327_p13 = pnand %p1326_p9, %p2039_p12  ;;  %p1333_p2 = scmp.lt.s32.totalorder %s1331_s10, %s1325_s6 }
 0x2da   : > { %s2041_s14 = smov %s2040_s18  ;;  %s1918_s7 = scalar_lea.hbm %s2040_s18, %s1007_s8 }
 0x2db   : > { %p1328_p11 = pneg %p1327_p13  ;;  %p1334_p8 = por %p1333_p2, %p1332_p3 }
 0x2dd   : > { %p1335_p4 = pnand %p1334_p8, %p1328_p11 }
 0x394   : > { %v657_v34 = vpop.f32.mrb[2].mxu0 }
 0x395   : > { %734 = vst.msk [vmem:[%s388_s5] sm:$0xff] %vm410_vm1, %v657_v34  ;;  %v1035_v35 = vpop.f32.mrb[3].mxu0 }
 0x398   : > { %v730_v36 = vpop.f32.mrb[2].mxu1 }
 0x399   : > { %735 = vst.msk [vmem:[%s388_s5 + $0x8] sm:$0xff] %vm410_vm1, %v730_v36  ;;  %v1040_v37 = vpop.f32.mrb[3].mxu1 }
 0x39a   : > { %1338 = shalt.err (!%p1335_p4)
}
 0x39b   : > { %s1339_s8 = scalar_lea.hbm %s1918_s7, 256  ;;  %s1343_s26 = scalar_lea.hbm %s2041_s14, 1024 }
 0x39c   : > { %p1340_p6 = scmp.ne.s32.totalorder %s1918_s7, %s1339_s8  ;;  %p1344_p1 = scmp.lt.u32.totalorder %s1918_s7, %s2041_s14 }
 0x39d   : > { %p1345_p10 = scmp.lt.u32.totalorder %s1343_s26, %s1339_s8  ;;  %p1347_p9 = scmp.lt.u32.totalorder %s1339_s8, %s1918_s7 }
 0x39e   : > { %p1341_p0 = pnand %p1340_p6, %p2039_p12 }
 0x39f   : > { %p1346_p7 = por %p1345_p10, %p1344_p1 }
 0x3a0   : > { %p1342_p5 = pneg %p1341_p0 }
 0x3a1   : > { %p1348_p13 = por %p1347_p9, %p1346_p7 }
 0x3a3   : > { %p1349_p11 = pnand %p1348_p13, %p1342_p5 }
 0x3a5   : > { %1352 = shalt.err (!%p1349_p11)
}
 0x3a6   : > { %1049 = dma.vmem_to_hbm [thread:$0]  (%p2039_p12), %s1911_s17, 256, %s1918_s7, %s737_s13, %s1470_s15, %s1470_s15, %s1471_s16  }
 0x3a7 PF: > { %p1074_p3 = scmp.ge.s32.totalorder %s1459_s28, 2  ;;  %s790_s6 = sand.u32 1, %s1431_s21  }
 0x3a8   : > { %p2042_p2 = scmp.ne.s32.totalorder %s2031_s29, 0  ;;  %s791_s9 = scalar_lea.sflag [#allocation4], %s790_s6 }
 0x3aa   : > { %p1067_p8 = pnand %p1074_p3, %p2042_p2 }
 0x3ac   : > { %1410 = dma.done.wait (!%p1067_p8), %s791_s9, 256  }
 0x3ad   : > { %1412 = vsyncadd (!%p1067_p8), %s791_s9, 4294967040  ;;  %s800_s25 = scalar_lea.sflag [#allocation12], %s790_s6 }
 0x3ae   : > { %1414 = dma.done.wait (!%p1067_p8), %s800_s25, 256  }
 0x3af   : > { %1416 = vsyncadd (!%p1067_p8), %s800_s25, 4294967040  ;;  %s31_s28 = sadd.s32 1, %s1459_s28   ;;  %s2043_s30 = sld [smem:[#allocation23_spill]] }
 0x3b0   : > { %p28_p4 = scmp.ge.s32.totalorder %s31_s28, 6   ;;  %s2044_s24 = sld [smem:[#allocation20_spill]] }
 0x3b1   : > { %s2045_s26 = sld [smem:[#allocation21_spill]]  ;;  %s2046_s29 = sld [smem:[#allocation22_spill]] }
 0x3b2   : > { %s2047_s18 = smov %s1423_s19  ;;  %s2048_s19 = smov %s1427_s20 }
 0x3b3   : > { %s2049_s20 = smov %s1750_s11  ;;  %s2050_s21 = smov %s1435_s22 }
 0x3b4   : > { %s2051_s22 = smov %s1439_s23  ;;  %s2053_s25 = smov %s1455_s27 }
 0x3b5   : > { %s2052_s23 = smov %s2043_s30  ;;  %30 = sbr.rel (!%p28_p4) target bundleno = 19 (0x13), region = 135 }
 0x3b7   : > { %s2054_s27 = smov %s2046_s29 }
 0x3bc   :  { %805 = vsyncpa [#allocation3], 1 }
 0x3bd   :  { %807 = vsyncpa [#allocation3 + $0x1], 1 }
 0x3be   :  { %808 = vsyncpa [#allocation6], 1 }
 0x3bf   :  { %810 = vsyncpa [#allocation6 + $0x1], 1 }
 0x3c0   :  { %811 = vsyncpa [#allocation9], 1 }
 0x3c1   :  { %813 = vsyncpa [#allocation9 + $0x1], 1 }
 0x3c2   :  { %814 = vsyncpa [#allocation4], 1 }
 0x3c3   :  { %816 = vsyncpa [#allocation4 + $0x1], 1 }
 0x3c4   :  { %817 = vsyncpa [#allocation12], 1 }
 0x3c5   :  { %819 = vsyncpa [#allocation12 + $0x1], 1 }

</bundles_post_ra>
